<compile_context>
chip_gen: v6e
topology: v6e:2x2x1
jax: 0.10.0
libtpu: 0.0.40
codegen_flags: <defaults>
</compile_context>

<pallas_src>
import functools

import jax
import jax.numpy as jnp
from jax.experimental import pallas as pl
from jax.experimental.pallas import tpu as pltpu


# -----------------------------------------------------------------------------
# Helpers
# -----------------------------------------------------------------------------
def _round_up(x, m):
    return (x + m - 1) // m * m


def _const_spec(shape):
    """BlockSpec that always maps to block (0, ..., 0) on a 1-D grid (resident input)."""
    n = len(shape)
    return pl.BlockSpec(shape, lambda i, n=n: (0,) * n)


def _pick_row_tile(rows, cap=512):
    # cap is a multiple of 8 (sublanes); the cdiv grid handles a partial tail block.
    return rows if rows <= cap else cap


def _pick_s_tile(S, bytes_per_pos, vmem_budget=4 << 20, cap=None):
    """Largest multiple-of-8 divisor of S whose double-buffered enc+eproj tile fits."""
    limit = S if cap is None else min(S, cap)
    limit = min(limit, max(8, vmem_budget // max(bytes_per_pos, 1)))
    if S <= limit:
        return S
    best = None
    t = 8
    while t <= limit:
        if S % t == 0:
            best = t
        t += 8
    # TODO(synk): mask padded source positions (-inf scores) to allow non-divisor S tiles.
    return best if best is not None else S


# -----------------------------------------------------------------------------
# Kernel 1: encoder projection (per source sequence, hoisted out of the step).
#   e_proj = (enc_flat @ W_ae + b_attn)  stored in the compute dtype.
# -----------------------------------------------------------------------------
def enc_proj_kernel(enc_flat_ref, w_ae_ref, b_attn_ref, out_ref):
    out_ref[...] = (
        jnp.dot(enc_flat_ref[...], w_ae_ref[...], preferred_element_type=jnp.float32)
        + b_attn_ref[...]
    ).astype(out_ref.dtype)


# -----------------------------------------------------------------------------
# Kernel 2: attention (online softmax over S tiles) + single-step LSTM (fused gates).
# Grid: (S // TS,), "arbitrary".  Outputs are written once, on the last S tile.
# -----------------------------------------------------------------------------
def attn_lstm_step_kernel(
    emb_ref,      # [Bp, E]        cdt  embedded (+dropout) token
    hid_ref,      # [Bp, Hd]       f32  previous hidden
    cell_ref,     # [Bp, Hd]       f32  previous cell
    enc_ref,      # [Bp, TS, De]   cdt  encoder outputs (S tile)
    eproj_ref,    # [Bp, TS, Hd]   cdt  precomputed enc @ W_ae + b_attn (S tile)
    w_ah_ref,     # [Hd, Hd]       cdt  attention weight (hidden part)
    v_ref,        # [1, Hd]        f32  attention scoring vector
    w_ih_e_ref,   # [E, 4*Hd]      cdt  fused LSTM input weights (embedded part)
    w_ih_w_ref,   # [De, 4*Hd]     cdt  fused LSTM input weights (context part)
    w_hh_ref,     # [Hd, 4*Hd]     cdt  fused LSTM hidden weights
    b_g_ref,      # [1, 4*Hd]      f32  fused gate biases (b_ih + b_hh), order i,f,g,o
    hout_ref,     # [Bp, Hd]  out  f32  new hidden
    cout_ref,     # [Bp, Hd]  out  f32  new cell
    wctx_ref,     # [Bp, De]  out  cdt  weighted context (feeds fc_out)
    m_sc,         # [Bp, 1]   scratch f32  running max
    l_sc,         # [Bp, 1]   scratch f32  running softmax denominator
    wacc_sc,      # [Bp, De]  scratch f32  running (unnormalized) weighted context
    hpart_sc,     # [Bp, Hd]  scratch f32  hid @ W_ah (computed once at s == 0)
    *,
    approx_recip,
):
    s = pl.program_id(0)
    n_s = pl.num_programs(0)
    Hd = hid_ref.shape[1]
    cdt = w_ah_ref.dtype                      # MXU / elementwise compute dtype

    @pl.when(s == 0)
    def _():
        m_sc[...] = jnp.full(m_sc.shape, -jnp.inf, dtype=m_sc.dtype)
        l_sc[...] = jnp.zeros(l_sc.shape, dtype=l_sc.dtype)
        wacc_sc[...] = jnp.zeros(wacc_sc.shape, dtype=wacc_sc.dtype)
        hpart_sc[...] = jnp.dot(hid_ref[...].astype(cdt), w_ah_ref[...],
                                preferred_element_type=jnp.float32)

    # ---- attention energies for this S tile ----------------------------------
    # add + tanh in the compute dtype (bf16 VPU/EUP on v6e/v7x); scores in f32.
    energy = jnp.tanh(eproj_ref[...] + hpart_sc[...].astype(cdt)[:, None, :])   # [Bp,TS,Hd]
    scores = jnp.sum(energy.astype(jnp.float32) * v_ref[...], axis=-1)          # [Bp,TS] f32

    # ---- online softmax update ------------------------------------------------
    m_prev = m_sc[...]
    m_new = jnp.maximum(m_prev, jnp.max(scores, axis=-1, keepdims=True))        # [Bp,1]
    alpha = jnp.exp(m_prev - m_new)                                              # [Bp,1]
    p = jnp.exp(scores - m_new)                                                  # [Bp,TS]
    l_sc[...] = alpha * l_sc[...] + jnp.sum(p, axis=-1, keepdims=True)
    # weighted context: VPU broadcast-multiply + sublane reduce (q=1 MXU is wasteful)
    wacc_sc[...] = alpha * wacc_sc[...] + jnp.sum(
        p[:, :, None] * enc_ref[...].astype(jnp.float32), axis=1)                # [Bp,De]
    m_sc[...] = m_new

    # ---- last S tile: normalize context, run the fused single-step LSTM -------
    @pl.when(s == n_s - 1)
    def _():
        inv_l = pl.reciprocal(l_sc[...], approx=approx_recip)                    # [Bp,1]
        weighted = wacc_sc[...] * inv_l                                          # [Bp,De] f32

        emb = emb_ref[...]                                                       # cdt
        gates = (
            jnp.dot(emb, w_ih_e_ref[...], preferred_element_type=jnp.float32)
            + jnp.dot(weighted.astype(cdt), w_ih_w_ref[...],
                      preferred_element_type=jnp.float32)
            + jnp.dot(hid_ref[...].astype(cdt), w_hh_ref[...],
                      preferred_element_type=jnp.float32)
            + b_g_ref[...]
        )                                                                        # [Bp,4Hd]

        i_g = jax.nn.sigmoid(gates[:, 0 * Hd:1 * Hd])
        f_g = jax.nn.sigmoid(gates[:, 1 * Hd:2 * Hd])
        g_g = jnp.tanh(gates[:, 2 * Hd:3 * Hd])
        o_g = jax.nn.sigmoid(gates[:, 3 * Hd:4 * Hd])

        c_new = f_g * cell_ref[...] + i_g * g_g
        h_new = o_g * jnp.tanh(c_new)

        hout_ref[...] = h_new
        cout_ref[...] = c_new
        wctx_ref[...] = weighted.astype(wctx_ref.dtype)


# -----------------------------------------------------------------------------
# Kernel 3: fc_out(cat(output, weighted, embedded)) with ONE fused weight slab,
# tiled over the padded vocab (lane-dense tiles, "parallel" grid).
# -----------------------------------------------------------------------------
def fc_out_kernel(fcin_ref, w_fc_ref, b_fc_ref, pred_ref):
    pred_ref[...] = (
        jnp.dot(fcin_ref[...], w_fc_ref[...], preferred_element_type=jnp.float32)
        + b_fc_ref[...]
    )


# -----------------------------------------------------------------------------
# Parameter prep (call ONCE per model): cast matmul weights to the MXU dtype,
# fuse the fc_out weights into a single [Hd+De+E, Vp] slab, pad vocab to the tile.
# -----------------------------------------------------------------------------
def prepare_params(params, compute_dtype=jnp.bfloat16, max_v_tile=1024):
    V = params["b_fc"].shape[1]
    TV = min(max_v_tile, _round_up(V, 128))       # lane-dense tile, v5e-safe cap
    Vp = _round_up(V, TV)
    pv = Vp - V
    c = lambda w: w.astype(compute_dtype)

    # fc_out: concat order (output/hidden, weighted context, embedded) must match fc_in.
    w_fc = jnp.concatenate(
        [params["w_fc_h"], params["w_fc_w"], params["w_fc_e"]], axis=0)          # [Hd+De+E, V]
    w_fc = jnp.pad(w_fc, ((0, 0), (0, pv)))
    b_fc = jnp.pad(params["b_fc"], ((0, 0), (0, pv)))

    return {
        "out_dim": V,
        "v_tile": TV,
        "embedding": c(params["embedding"]),
        "w_ah": c(params["w_ah"]),
        "w_ae": c(params["w_ae"]),
        "b_attn": params["b_attn"].astype(jnp.float32),
        "v": params["v"].astype(jnp.float32),
        "w_ih_e": c(params["w_ih_e"]),
        "w_ih_w": c(params["w_ih_w"]),
        "w_hh": c(params["w_hh"]),
        "b_g": params["b_g"].astype(jnp.float32),
        "w_fc": c(w_fc),
        "b_fc": b_fc.astype(jnp.float32),
    }


# -----------------------------------------------------------------------------
# Per-source-sequence precompute (call ONCE per source sequence; invariant across
# decoder time steps).  Returns (enc_c [Bp,S,De] cdt, e_proj [Bp,S,Hd] cdt).
# -----------------------------------------------------------------------------
def precompute_encoder_projection(prep, encoder_outputs):
    S, B, De = encoder_outputs.shape
    cdt = prep["w_ae"].dtype
    b_mult = 16 if cdt == jnp.bfloat16 else 8     # bf16 packs 16 rows per sublane group
    Bp = _round_up(B, b_mult)
    Hd = prep["w_ae"].shape[1]

    enc = jnp.transpose(encoder_outputs, (1, 0, 2))                              # [B, S, De]
    enc = jnp.pad(enc, ((0, Bp - B), (0, 0), (0, 0)))                            # [Bp, S, De]
    enc_c = enc.astype(cdt)
    enc_flat = enc_c.reshape(Bp * S, De)                                         # wrapper-side flatten

    rows = Bp * S
    TM = _pick_row_tile(rows)
    e_proj_flat = pl.pallas_call(
        enc_proj_kernel,
        grid=(pl.cdiv(rows, TM),),
        in_specs=[pl.BlockSpec((TM, De), lambda i: (i, 0)),
                  pl.BlockSpec((De, Hd), lambda i: (0, 0)),
                  pl.BlockSpec((1, Hd), lambda i: (0, 0))],
        out_specs=pl.BlockSpec((TM, Hd), lambda i: (i, 0)),
        out_shape=jax.ShapeDtypeStruct((rows, Hd), cdt),
        compiler_params=pltpu.CompilerParams(dimension_semantics=("parallel",)),
    )(enc_flat, prep["w_ae"], prep["b_attn"])

    return enc_c, e_proj_flat.reshape(Bp, S, Hd)


# -----------------------------------------------------------------------------
# One decode step from pre-projected encoder state (the per-step hot path).
# -----------------------------------------------------------------------------
def decoder_attn_step(prep, input_ids, hidden, cell, enc_c, e_proj, *, s_tile_cap=None):
    B = input_ids.shape[0]
    Bp, S, De = enc_c.shape
    Hd = hidden.shape[1]
    E = prep["embedding"].shape[1]
    K = prep["w_fc"].shape[0]                      # Hd + De + E
    Vp = prep["b_fc"].shape[1]
    V = prep["out_dim"]
    TV = prep["v_tile"]
    cdt = enc_c.dtype
    approx_recip = bool(cdt == jnp.bfloat16)

    # Embedding lookup + dropout (eval-mode identity) as wrapper glue.
    emb = prep["embedding"][input_ids]                                           # [B, E] cdt
    pad_b = lambda x: jnp.pad(x, ((0, Bp - B), (0, 0)))
    emb_p = pad_b(emb)
    hid_p = pad_b(hidden.astype(jnp.float32))
    cell_p = pad_b(cell[0].astype(jnp.float32))

    # ---- attention + LSTM, S-tiled with online softmax ------------------------
    bytes_per_pos = 2 * Bp * (De + Hd) * jnp.dtype(cdt).itemsize                 # double-buffered
    TS = _pick_s_tile(S, bytes_per_pos, cap=s_tile_cap)
    nst = S // TS

    step_in = (emb_p, hid_p, cell_p, enc_c, e_proj,
               prep["w_ah"], prep["v"],
               prep["w_ih_e"], prep["w_ih_w"], prep["w_hh"], prep["b_g"])
    in_specs = [
        _const_spec((Bp, E)),
        _const_spec((Bp, Hd)),
        _const_spec((Bp, Hd)),
        pl.BlockSpec((Bp, TS, De), lambda s: (0, s, 0)),
        pl.BlockSpec((Bp, TS, Hd), lambda s: (0, s, 0)),
        _const_spec((Hd, Hd)),
        _const_spec((1, Hd)),
        _const_spec((E, 4 * Hd)),
        _const_spec((De, 4 * Hd)),
        _const_spec((Hd, 4 * Hd)),
        _const_spec((1, 4 * Hd)),
    ]

    h_new, c_new, weighted = pl.pallas_call(
        functools.partial(attn_lstm_step_kernel, approx_recip=approx_recip),
        grid=(nst,),
        in_specs=in_specs,
        out_specs=(_const_spec((Bp, Hd)), _const_spec((Bp, Hd)), _const_spec((Bp, De))),
        out_shape=(jax.ShapeDtypeStruct((Bp, Hd), jnp.float32),
                   jax.ShapeDtypeStruct((Bp, Hd), jnp.float32),
                   jax.ShapeDtypeStruct((Bp, De), cdt)),
        scratch_shapes=[pltpu.VMEM((Bp, 1), jnp.float32),
                        pltpu.VMEM((Bp, 1), jnp.float32),
                        pltpu.VMEM((Bp, De), jnp.float32),
                        pltpu.VMEM((Bp, Hd), jnp.float32)],
        compiler_params=pltpu.CompilerParams(dimension_semantics=("arbitrary",)),
    )(*step_in)

    # ---- fc_out over lane-dense vocab tiles, single fused weight slab ---------
    # Concat once, in the compute dtype; order must match prep["w_fc"] (h, weighted, emb).
    fc_in = jnp.concatenate([h_new.astype(cdt), weighted, emb_p], axis=-1)       # [Bp, K]

    nvt = Vp // TV
    pred_p = pl.pallas_call(
        fc_out_kernel,
        grid=(nvt,),
        in_specs=[
            pl.BlockSpec((Bp, K), lambda j: (0, 0)),
            pl.BlockSpec((K, TV), lambda j: (0, j)),
            pl.BlockSpec((1, TV), lambda j: (0, j)),
        ],
        out_specs=pl.BlockSpec((Bp, TV), lambda j: (0, j)),
        out_shape=jax.ShapeDtypeStruct((Bp, Vp), jnp.float32),
        compiler_params=pltpu.CompilerParams(
            dimension_semantics=("parallel",),
            vmem_limit_bytes=48 * 1024 * 1024),
    )(fc_in, prep["w_fc"], prep["b_fc"])

    pred = pred_p[:B, :V]
    return pred, h_new[:B], c_new[:B][None]                                      # cell back to [1,B,Hd]


# -----------------------------------------------------------------------------
# Convenience forward matching the PyTorch module's single-step API.
# NOTE: for a decode loop, call prepare_params once per model and
# precompute_encoder_projection once per source sequence, then loop decoder_attn_step.
# -----------------------------------------------------------------------------
def decoder_attn_forward(params, input_ids, hidden, cell, encoder_outputs,
                         compute_dtype=jnp.bfloat16, s_tile_cap=None, max_v_tile=1024):
    """input_ids [B] int32, hidden [B,Hd], cell [1,B,Hd], encoder_outputs [S,B,2*He]."""
    prep = prepare_params(params, compute_dtype, max_v_tile=max_v_tile)
    enc_c, e_proj = precompute_encoder_projection(prep, encoder_outputs)
    return decoder_attn_step(prep, input_ids, hidden, cell, enc_c, e_proj,
                             s_tile_cap=s_tile_cap)


# -----------------------------------------------------------------------------
# Pure-JAX reference (f32, same fused-gate param layout).
# -----------------------------------------------------------------------------
def decoder_attn_reference(params, input_ids, hidden, cell, encoder_outputs):
    P = jax.lax.Precision.HIGHEST
    Hd = hidden.shape[1]
    emb = params["embedding"][input_ids]
    enc = jnp.transpose(encoder_outputs, (1, 0, 2))
    c0 = cell[0]

    e_part = jnp.einsum("bsd,dh->bsh", enc, params["w_ae"], precision=P)
    h_part = jnp.dot(hidden, params["w_ah"], precision=P)
    energy = jnp.tanh(e_part + h_part[:, None, :] + params["b_attn"])
    scores = jnp.sum(energy * params["v"], axis=-1)
    a = jax.nn.softmax(scores, axis=1)
    weighted = jnp.einsum("bs,bsd->bd", a, enc, precision=P)

    gates = (jnp.dot(emb, params["w_ih_e"], precision=P)
             + jnp.dot(weighted, params["w_ih_w"], precision=P)
             + jnp.dot(hidden, params["w_hh"], precision=P)
             + params["b_g"])
    i = jax.nn.sigmoid(gates[:, 0 * Hd:1 * Hd])
    f = jax.nn.sigmoid(gates[:, 1 * Hd:2 * Hd])
    g = jnp.tanh(gates[:, 2 * Hd:3 * Hd])
    o = jax.nn.sigmoid(gates[:, 3 * Hd:4 * Hd])
    c_new = f * c0 + i * g
    h_new = o * jnp.tanh(c_new)

    pred = (jnp.dot(h_new, params["w_fc_h"], precision=P)
            + jnp.dot(weighted, params["w_fc_w"], precision=P)
            + jnp.dot(emb, params["w_fc_e"], precision=P)
            + params["b_fc"])
    return pred, h_new, c_new[None]


def init_params(key, output_dim, emb_dim, enc_hid_dim, dec_hid_dim):
    De = 2 * enc_hid_dim
    Hd = dec_hid_dim
    E = emb_dim
    V = output_dim
    ks = jax.random.split(key, 13)
    n = lambda k, s: (jax.random.normal(k, s, dtype=jnp.float32) * 0.1)
    return {
        "embedding": n(ks[0], (V, E)),
        # attention: Linear(De + Hd -> Hd), concat order (hidden, enc_out)
        "w_ah": n(ks[1], (Hd, Hd)),
        "w_ae": n(ks[2], (De, Hd)),
        "b_attn": n(ks[3], (1, Hd)),
        "v": n(ks[4], (1, Hd)),
        # LSTM(E + De -> Hd), fused gates i,f,g,o along the last axis
        "w_ih_e": n(ks[5], (E, 4 * Hd)),
        "w_ih_w": n(ks[6], (De, 4 * Hd)),
        "w_hh": n(ks[7], (Hd, 4 * Hd)),
        "b_g": n(ks[8], (1, 4 * Hd)),     # b_ih + b_hh combined
        # fc_out: Linear(Hd + De + E -> V), concat order (output, weighted, embedded)
        "w_fc_h": n(ks[9], (Hd, V)),
        "w_fc_w": n(ks[10], (De, V)),
        "w_fc_e": n(ks[11], (E, V)),
        "b_fc": n(ks[12], (1, V)),
    }


if __name__ == "__main__":
    # Small shapes consistent with the module's forward.
    output_dim = 64   # vocab size
    emb_dim = 32
    enc_hid_dim = 16  # -> encoder feature dim 2*16 = 32
    dec_hid_dim = 32
    batch = 4
    src_len = 8

    key = jax.random.PRNGKey(0)
    k_par, k_in, k_h, k_c, k_enc, k_enc2 = jax.random.split(key, 6)

    params = init_params(k_par, output_dim, emb_dim, enc_hid_dim, dec_hid_dim)

    input_ids = jax.random.randint(k_in, (batch,), 0, output_dim, dtype=jnp.int32)
    hidden = jax.random.normal(k_h, (batch, dec_hid_dim), dtype=jnp.float32)
    cell = jax.random.normal(k_c, (1, batch, dec_hid_dim), dtype=jnp.float32)
    encoder_outputs = jax.random.normal(
        k_enc, (src_len, batch, 2 * enc_hid_dim), dtype=jnp.float32)

    pred_r, h_r, c_r = decoder_attn_reference(
        params, input_ids, hidden, cell, encoder_outputs)

    # bf16 MXU path (v6e/v7x native; f32 accumulation + f32 softmax/gate math).
    pred, h_new, c_new = decoder_attn_forward(
        params, input_ids, hidden, cell, encoder_outputs, compute_dtype=jnp.bfloat16)
    jax.block_until_ready((pred, h_new, c_new))

    assert pred.shape == (batch, output_dim)
    assert h_new.shape == (batch, dec_hid_dim)
    assert c_new.shape == (1, batch, dec_hid_dim)
    assert jnp.allclose(pred, pred_r, rtol=5e-2, atol=5e-2)
    assert jnp.allclose(h_new, h_r, rtol=5e-2, atol=5e-2)
    assert jnp.allclose(c_new, c_r, rtol=5e-2, atol=5e-2)

    # f32 MXU path (v5e-friendly: f32 VPU/EUP, exact reciprocal), tighter check.
    pred32, h32, c32 = decoder_attn_forward(
        params, input_ids, hidden, cell, encoder_outputs, compute_dtype=jnp.float32)
    jax.block_until_ready((pred32, h32, c32))
    assert jnp.allclose(pred32, pred_r, rtol=2e-2, atol=2e-2)
    assert jnp.allclose(h32, h_r, rtol=2e-2, atol=2e-2)
    assert jnp.allclose(c32, c_r, rtol=2e-2, atol=2e-2)

    # Multi-tile online-softmax path: S=16, force TS=8 -> 2 S tiles.
    enc16 = jax.random.normal(k_enc2, (16, batch, 2 * enc_hid_dim), dtype=jnp.float32)
    pr_ref, hh_ref, cc_ref = decoder_attn_reference(params, input_ids, hidden, cell, enc16)
    pr, hh, cc = decoder_attn_forward(
        params, input_ids, hidden, cell, enc16, compute_dtype=jnp.float32, s_tile_cap=8)
    jax.block_until_ready((pr, hh, cc))
    assert jnp.allclose(pr, pr_ref, rtol=2e-2, atol=2e-2)
    assert jnp.allclose(hh, hh_ref, rtol=2e-2, atol=2e-2)
    assert jnp.allclose(cc, cc_ref, rtol=2e-2, atol=2e-2)

    print("KERNEL_OK")
</pallas_src>

<mosaic_0001>
module attributes {stable_mosaic.version = 11 : i64} {
  func.func @enc_proj_kernel(%arg0: i32, %arg1: memref<128x32xbf16, #tpu.memory_space<vmem>>, %arg2: memref<32x32xbf16, #tpu.memory_space<vmem>>, %arg3: memref<1x32xf32, #tpu.memory_space<vmem>>, %arg4: memref<128x32xbf16, #tpu.memory_space<vmem>>) attributes {dimension_semantics = [#tpu.dimension_semantics<parallel>], iteration_bounds = array<i64: 1>, scalar_prefetch = 0 : i64, scratch_operands = 0 : i64, tpu.core_type = #tpu.core_type<tc>, window_params = [{transform_indices = @transform_0, window_bounds = array<i64: 128, 32>}, {pipeline_mode = #tpu.pipeline_mode<synchronous>, transform_indices = @transform_1, window_bounds = array<i64: 32, 32>}, {pipeline_mode = #tpu.pipeline_mode<synchronous>, transform_indices = @transform_2, window_bounds = array<i64: 1, 32>}, {transform_indices = @transform_3, window_bounds = array<i64: 128, 32>}]} {
    %c0 = arith.constant 0 : index
    %c0_0 = arith.constant 0 : index
    %0 = vector.load %arg1[%c0, %c0_0] : memref<128x32xbf16, #tpu.memory_space<vmem>>, vector<128x32xbf16>
    %c0_1 = arith.constant 0 : index
    %c0_2 = arith.constant 0 : index
    %1 = vector.load %arg2[%c0_1, %c0_2] : memref<32x32xbf16, #tpu.memory_space<vmem>>, vector<32x32xbf16>
    %cst = arith.constant dense<0.000000e+00> : vector<128x32xf32>
    %2 = tpu.matmul %0, %1, %cst {dimension_numbers = #tpu.dot_dimension_numbers<[1], [0], [0], [1], [0, 0, 1, 1], [], []>} : vector<128x32xbf16>, vector<32x32xbf16>, vector<128x32xf32> -> vector<128x32xf32>
    %c0_3 = arith.constant 0 : index
    %c0_4 = arith.constant 0 : index
    %3 = vector.load %arg3[%c0_3, %c0_4] : memref<1x32xf32, #tpu.memory_space<vmem>>, vector<1x32xf32>
    %4 = vector.broadcast %3 : vector<1x32xf32> to vector<128x32xf32>
    %5 = arith.addf %2, %4 : vector<128x32xf32>
    %6 = arith.truncf %5 : vector<128x32xf32> to vector<128x32xbf16>
    %c0_5 = arith.constant 0 : index
    %c0_6 = arith.constant 0 : index
    %7 = vector.load %arg4[%c0_5, %c0_6] : memref<128x32xbf16, #tpu.memory_space<vmem>>, vector<128x32xbf16>
    tpu.vector_store %arg4[%c0_5, %c0_6], %6 {strides = array<i32>} : memref<128x32xbf16, #tpu.memory_space<vmem>>, vector<128x32xbf16>,
    return
  }
  func.func @transform_0(%arg0: i32) -> (i32, i32) {
    %c0_i32 = arith.constant 0 : i32
    %c0_i32_0 = arith.constant 0 : i32
    return %arg0, %c0_i32 : i32, i32
  }
  func.func @transform_1(%arg0: i32) -> (i32, i32) {
    %c0_i32 = arith.constant 0 : i32
    %c0_i32_0 = arith.constant 0 : i32
    %c0_i32_1 = arith.constant 0 : i32
    return %c0_i32, %c0_i32_0 : i32, i32
  }
  func.func @transform_2(%arg0: i32) -> (i32, i32) {
    %c0_i32 = arith.constant 0 : i32
    %c0_i32_0 = arith.constant 0 : i32
    %c0_i32_1 = arith.constant 0 : i32
    return %c0_i32, %c0_i32_0 : i32, i32
  }
  func.func @transform_3(%arg0: i32) -> (i32, i32) {
    %c0_i32 = arith.constant 0 : i32
    %c0_i32_0 = arith.constant 0 : i32
    return %arg0, %c0_i32 : i32, i32
  }
}

</mosaic_0001>

<bundles_post_ra>
// kernel: tpu_custom_call.1
= control target key start
LH: loop header
LB: loop body
LE: loop exit
PB: predicated region body
PF: predicated region fallthrough
CT: control target
= control target key end

     0   :  { %vm94_vm0 = vcmask 261120   ;;  %vm280_vm1 = vcmask 257024   ;;  %s521_s1 = inlined_call_operand.vmem [shape: bf16[32,32], index: 1, kind: input, shape index: {}]   ;;  %s522_s0 = inlined_call_operand.vmem [shape: bf16[128,32], index: 0, kind: input, shape index: {}]   ;;  %s523_s2 = inlined_call_operand.vmem [shape: f32[1,32], index: 2, kind: input, shape index: {}]   ;;  %s524_s3 = inlined_call_operand.vmem [shape: bf16[128,32], index: 3, kind: output, shape index: {}]  }
   0x1   :  { %v386_v0 = vld [vmem:[%s521_s1 + $0x8] sm:$0xff]   ;;  %v387_v1 = vld [vmem:[%s521_s1] sm:$0xff]   ;;  %v392_v6 = vld [vmem:[%s522_s0 + $0x10] sm:$0xff]  }
   0x2   :  { %362 = vmatprep.subr.bf16.mxu0 %v386_v0  ;;  %382 = vmatprep.subr.bf16.mxu1 %v386_v0  ;;  %v388_v2 = vld [vmem:[%s522_s0] sm:$0xff]   ;;  %v390_v4 = vld [vmem:[%s522_s0 + $0x8] sm:$0xff]   ;;  %v393_v7 = vld [vmem:[%s522_s0 + $0x30] sm:$0xff]  }
   0x3   :  { %363 = vmatpush3.bf16.msra.mxu0 %v386_v0  ;;  %384 = vmatpush3.bf16.msra.mxu1 %v386_v0  ;;  %v389_v3 = vld [vmem:[%s522_s0 + $0x20] sm:$0xff]   ;;  %v391_v5 = vld [vmem:[%s522_s0 + $0x28] sm:$0xff]   ;;  %v394_v8 = vld [vmem:[%s522_s0 + $0x18] sm:$0xff]  }
   0x4   :  { %364 = vmatprep.subr.bf16.mxu0 %v387_v1  ;;  %383 = vmatprep.subr.bf16.mxu1 %v387_v1  ;;  %v395_v9 = vld [vmem:[%s522_s0 + $0x38] sm:$0xff]   ;;  %v301_v10 = vld [vmem:[%s523_s2] ss:$0 sm:$0xff] }
   0x5   :  { %366 = vmatprep.mubr.msk.bf16.mxu0 %vm94_vm0, %v388_v2  ;;  %374 = vmatprep.mubr.msk.bf16.mxu1 %vm94_vm0, %v389_v3 }
   0x7   :  { %365 = vmatpush3.bf16.msra.mxu0 %v387_v1  ;;  %385 = vmatpush3.bf16.msra.mxu1 %v387_v1 }
   0xa   :  { %367 = vmatmul.mubr.msk.bf16.vlgmr.msra.gmra.mxu0 %vm94_vm0, %v390_v4  ;;  %375 = vmatmul.mubr.msk.bf16.vlgmr.msra.gmra.mxu1 %vm94_vm0, %v391_v5 }
   0xb   :  { %370 = vmatprep.mubr.msk.bf16.mxu0 %vm94_vm0, %v392_v6  ;;  %378 = vmatprep.mubr.msk.bf16.mxu1 %vm94_vm0, %v393_v7 }
  0x12   :  { %371 = vmatmul.mubr.msk.bf16.gmra.mxu0 %vm94_vm0, %v394_v8  ;;  %379 = vmatmul.mubr.msk.bf16.gmra.mxu1 %vm94_vm0, %v395_v9 }
  0xca   :  { %v368_v11 = vpop.f32.mrf.mxu0  ;;  %v376_v12 = vpop.f32.mrf.mxu1 }
  0xcb   :  { %v162_v13 = vadd.f32 %v368_v11, %v301_v10  ;;  %v194_v14 = vadd.f32 %v376_v12, %v301_v10 }
  0xcc   :  { %v153_v15 = vpop.f32.mrf.mxu0  ;;  %v185_v16 = vpop.f32.mrf.mxu1 }
  0xcd   :  { %v338_v17 = vpack.c.bf16 %v162_v13, %v162_v13  ;;  %v346_v18 = vpack.c.bf16 %v194_v14, %v194_v14  ;;  %v154_v19 = vadd.f32 %v301_v10, %v153_v15  ;;  %v186_v20 = vadd.f32 %v301_v10, %v185_v16 }
  0xce   :  { %v369_v21 = vpop.f32.mrf.mxu0  ;;  %v377_v22 = vpop.f32.mrf.mxu1 }
  0xcf   :  { %283 = vst.msk [vmem:[%s524_s3 + $0x8] sm:$0xf] %vm280_vm1, %v338_v17  ;;  %291 = vst.msk [vmem:[%s524_s3 + $0x28] sm:$0xf] %vm280_vm1, %v346_v18  ;;  %v336_v23 = vpack.c.bf16 %v154_v19, %v154_v19  ;;  %v344_v24 = vpack.c.bf16 %v186_v20, %v186_v20  ;;  %v165_v25 = vadd.f32 %v369_v21, %v301_v10 }
  0xd0   :  { %v197_v26 = vadd.f32 %v377_v22, %v301_v10  ;;  %v156_v27 = vpop.f32.mrf.mxu0  ;;  %v188_v28 = vpop.f32.mrf.mxu1 }
  0xd1   :  { %281 = vst.msk [vmem:[%s524_s3] sm:$0xf] %vm280_vm1, %v336_v23  ;;  %289 = vst.msk [vmem:[%s524_s3 + $0x20] sm:$0xf] %vm280_vm1, %v344_v24  ;;  %v339_v29 = vpack.c.bf16 %v165_v25, %v165_v25  ;;  %v157_v31 = vadd.f32 %v301_v10, %v156_v27  ;;  %v189_v32 = vadd.f32 %v301_v10, %v188_v28 }
  0xd2   :  { %v347_v30 = vpack.c.bf16 %v197_v26, %v197_v26  ;;  %v372_v33 = vpop.f32.mrf.mxu0  ;;  %v380_v34 = vpop.f32.mrf.mxu1 }
  0xd3   :  { %284 = vst.msk [vmem:[%s524_s3 + $0xc] sm:$0xf] %vm280_vm1, %v339_v29  ;;  %v337_v35 = vpack.c.bf16 %v157_v31, %v157_v31  ;;  %v345_v36 = vpack.c.bf16 %v189_v32, %v189_v32  ;;  %v178_v37 = vadd.f32 %v372_v33, %v301_v10  ;;  %v210_v38 = vadd.f32 %v380_v34, %v301_v10 }
  0xd4   :  { %292 = vst.msk [vmem:[%s524_s3 + $0x2c] sm:$0xf] %vm280_vm1, %v347_v30  ;;  %v169_v39 = vpop.f32.mrf.mxu0  ;;  %v201_v40 = vpop.f32.mrf.mxu1 }
  0xd5   :  { %282 = vst.msk [vmem:[%s524_s3 + $0x4] sm:$0xf] %vm280_vm1, %v337_v35  ;;  %290 = vst.msk [vmem:[%s524_s3 + $0x24] sm:$0xf] %vm280_vm1, %v345_v36  ;;  %v342_v41 = vpack.c.bf16 %v178_v37, %v178_v37  ;;  %v350_v42 = vpack.c.bf16 %v210_v38, %v210_v38  ;;  %v170_v43 = vadd.f32 %v301_v10, %v169_v39 }
  0xd6   :  { %v202_v44 = vadd.f32 %v301_v10, %v201_v40  ;;  %v373_v45 = vpop.f32.mrf.mxu0  ;;  %v381_v46 = vpop.f32.mrf.mxu1 }
  0xd7   :  { %287 = vst.msk [vmem:[%s524_s3 + $0x18] sm:$0xf] %vm280_vm1, %v342_v41  ;;  %295 = vst.msk [vmem:[%s524_s3 + $0x38] sm:$0xf] %vm280_vm1, %v350_v42  ;;  %v340_v47 = vpack.c.bf16 %v170_v43, %v170_v43  ;;  %v181_v49 = vadd.f32 %v373_v45, %v301_v10  ;;  %v213_v50 = vadd.f32 %v381_v46, %v301_v10 }
  0xd8   :  { %v348_v48 = vpack.c.bf16 %v202_v44, %v202_v44  ;;  %v172_v51 = vpop.f32.mrf.mxu0  ;;  %v204_v52 = vpop.f32.mrf.mxu1 }
  0xd9   :  { %285 = vst.msk [vmem:[%s524_s3 + $0x10] sm:$0xf] %vm280_vm1, %v340_v47  ;;  %v343_v53 = vpack.c.bf16 %v181_v49, %v181_v49  ;;  %v351_v54 = vpack.c.bf16 %v213_v50, %v213_v50  ;;  %v173_v55 = vadd.f32 %v301_v10, %v172_v51  ;;  %v205_v56 = vadd.f32 %v301_v10, %v204_v52 }
  0xda   :  { %293 = vst.msk [vmem:[%s524_s3 + $0x30] sm:$0xf] %vm280_vm1, %v348_v48 }
  0xdb   :  { %288 = vst.msk [vmem:[%s524_s3 + $0x1c] sm:$0xf] %vm280_vm1, %v343_v53  ;;  %296 = vst.msk [vmem:[%s524_s3 + $0x3c] sm:$0xf] %vm280_vm1, %v351_v54  ;;  %v341_v57 = vpack.c.bf16 %v173_v55, %v173_v55  ;;  %v349_v58 = vpack.c.bf16 %v205_v56, %v205_v56 }
  0xdd   :  { %286 = vst.msk [vmem:[%s524_s3 + $0x14] sm:$0xf] %vm280_vm1, %v341_v57  ;;  %294 = vst.msk [vmem:[%s524_s3 + $0x34] sm:$0xf] %vm280_vm1, %v349_v58 }

</bundles_post_ra>
